<compile_context>
chip_gen: v5e
topology: v5e:2x2
jax: 0.10.0
libtpu: 0.0.40
codegen_flags: <defaults>
</compile_context>

<pallas_src>
import functools

import jax
import jax.numpy as jnp
from jax import lax
from jax.experimental import pallas as pl
from jax.experimental.pallas import tpu as pltpu


# ----------------------------------------------------------------------------
# Packed-parameter layout (shared by the host packer and the kernel carver)
# ----------------------------------------------------------------------------
def _round_up(x, m):
    return ((x + m - 1) // m) * m


def _pack_layout(C, hid, H):
    w_r1 = 0
    w_r2 = _round_up(C, 16)                    # bf16 sublane tile = 16 rows -> aligned carves
    w_rm = w_r2 + _round_up(hid, 16)
    w_rows = w_rm + _round_up(C, 16)
    cols = _round_up(max(H * hid + H, H * C + H, C), 128)
    p_rows = _round_up(2 * H + 3, 8)
    return dict(w_r1=w_r1, w_r2=w_r2, w_rm=w_rm, w_rows=w_rows, w_cols=cols,
                p_rows=p_rows, p_cols=cols)


def pack_params(params, num_heads=2):
    """Done ONCE at init: pack 10 tensors into one bf16 weight slab + one f32 scalar slab."""
    H = num_heads
    C = params["wm"].shape[0]
    hid = params["al1"].shape[1]
    L = _pack_layout(C, hid, H)

    def augment(w, ar, dout):
        # x @ [W | W_1 ar_1 | ... | W_H ar_H]  ->  z and er in one MXU call (er fold).
        cols = [w] + [w[:, h * dout:(h + 1) * dout] @ ar[h][:, None] for h in range(H)]
        return jnp.concatenate(cols, axis=1)

    w1_aug = augment(params["w1"], params["ar1"], hid)      # (C,   H*hid + H)
    w2_aug = augment(params["w2"], params["ar2"], C)        # (hid, H*C  + H)

    wbuf = jnp.zeros((L["w_rows"], L["w_cols"]), jnp.float32)
    wbuf = wbuf.at[L["w_r1"]:L["w_r1"] + C,   :w1_aug.shape[1]].set(w1_aug)
    wbuf = wbuf.at[L["w_r2"]:L["w_r2"] + hid, :w2_aug.shape[1]].set(w2_aug)
    wbuf = wbuf.at[L["w_rm"]:L["w_rm"] + C,   :C].set(params["wm"])
    wbuf = wbuf.astype(jnp.bfloat16)          # pre-cast: halves weight bytes, removes in-kernel casts

    def block_diag_rows(al, dout):
        # row h holds attn_l of head h in columns [h*dout, (h+1)*dout); zeros elsewhere
        out = jnp.zeros((H, L["p_cols"]), jnp.float32)
        for h in range(H):
            out = out.at[h, h * dout:(h + 1) * dout].set(al[h])
        return out

    pbuf = jnp.zeros((L["p_rows"], L["p_cols"]), jnp.float32)
    pbuf = pbuf.at[0:H, :].set(block_diag_rows(params["al1"], hid))
    pbuf = pbuf.at[H, :hid].set(jnp.mean(params["b1"], axis=0))          # hoisted head-mean bias
    pbuf = pbuf.at[H + 1:2 * H + 1, :].set(block_diag_rows(params["al2"], C))
    pbuf = pbuf.at[2 * H + 1, :C].set(jnp.mean(params["b2"], axis=0))
    pbuf = pbuf.at[2 * H + 2, :C].set(params["bm"][0])
    return {"w": wbuf, "p": pbuf, "H": H, "C": C, "hid": hid}


# ----------------------------------------------------------------------------
# Fused kernel body
# ----------------------------------------------------------------------------
def _gat_layer(x, w_aug, al_blk, b_mean, edge_mask, *, num_heads, out_feats):
    """One DGL-style GATConv (eval) + mean over heads + ELU, on in-VMEM values.

    x: (N, Din) f32; w_aug: (Din, H*Dout + H) bf16 (last H cols = er fold);
    al_blk: (H, H*Dout + H) f32 block-diagonal attn_l; b_mean: (1, Dout) f32;
    edge_mask: (N, N) bool, edge_mask[dst, src]. Returns (N, Dout) f32.
    """
    H, D = num_heads, out_feats
    # Feature projection + er fold on the MXU: bf16 operands, f32 accumulation.
    z_full = jnp.dot(x.astype(jnp.bfloat16), w_aug,
                     preferred_element_type=jnp.float32)                 # (N, H*D + H)
    # el for all heads in one NT matmul (block-diagonal attn_l): el_all[h, u] = <z_u^h, attn_l^h>
    el_all = lax.dot_general(al_blk, z_full, (((1,), (1,)), ((), ())),
                             preferred_element_type=jnp.float32)         # (H, N)

    acc = None
    for h in range(H):                                                   # static, H == 2
        zh = z_full[:, h * D:(h + 1) * D]                                # (N, D)
        er_col = z_full[:, H * D + h:H * D + h + 1]                      # (N, 1)
        # e[v, u] = leaky_relu(er[v] + el[u], 0.2), only over edges u -> v (f32 elementwise).
        e = er_col + el_all[h:h + 1, :]                                  # (N, N)
        e = jnp.maximum(e, 0.2 * e)                                      # leaky_relu, slope < 1
        e = jnp.where(edge_mask, e, -1e30)
        # Edge softmax over incoming edges (rows): exp(-1e30 - rowmax) underflows to exactly 0,
        # so no second mask is needed; self-loops keep rowmax coming from a real edge.
        e = e - jnp.max(e, axis=1, keepdims=True)
        p = jnp.exp(e)
        denom = jnp.maximum(jnp.sum(p, axis=1, keepdims=True), 1e-30)
        a_h = p * pl.reciprocal(denom, approx=True)                      # EUP reciprocal
        # Per-head aggregation as its own MXU matmul, accumulated in f32 (no lane-axis concat).
        r = jnp.dot(a_h.astype(jnp.bfloat16), zh.astype(jnp.bfloat16),
                    preferred_element_type=jnp.float32)                  # (N, D)
        acc = r if acc is None else acc + r

    # Head mean (scale folded) + hoisted mean of per-head biases, then ELU(alpha=1).
    m = acc * (1.0 / H) + b_mean
    return jnp.where(m > 0.0, m, jnp.exp(jnp.minimum(m, 0.0)) - 1.0)


def _spatio_fused_kernel(x_ref, adj_ref, w_ref, p_ref, out_ref, *, H, C, hid):
    L = _pack_layout(C, hid, H)
    edge_mask = adj_ref[...] > 0.0

    # Static carves of the packed parameter slabs (static slices -> cheap sub-window loads).
    w1 = w_ref[L["w_r1"]:L["w_r1"] + C,   0:H * hid + H]      # (C,   H*hid+H) bf16
    w2 = w_ref[L["w_r2"]:L["w_r2"] + hid, 0:H * C + H]        # (hid, H*C +H) bf16
    wm = w_ref[L["w_rm"]:L["w_rm"] + C,   0:C]                # (C, C) bf16
    al1 = p_ref[0:H, 0:H * hid + H]                           # (H, H*hid+H) f32 block-diag
    b1m = p_ref[H:H + 1, 0:hid]                               # (1, hid)
    al2 = p_ref[H + 1:2 * H + 1, 0:H * C + H]                 # (H, H*C+H)
    b2m = p_ref[2 * H + 1:2 * H + 2, 0:C]                     # (1, C)
    bm = p_ref[2 * H + 2:2 * H + 3, 0:C]                      # (1, C)

    # GATEncoder layer 1: (N, C) -> (N, 3C);  layer 2: (N, 3C) -> (N, C)
    h1 = _gat_layer(x_ref[...], w1, al1, b1m, edge_mask, num_heads=H, out_feats=hid)
    h2 = _gat_layer(h1, w2, al2, b2m, edge_mask, num_heads=H, out_feats=C)

    # SpatioModel.mlp + F.leaky_relu (torch default negative_slope = 0.01)
    y = jnp.dot(h2.astype(jnp.bfloat16), wm, preferred_element_type=jnp.float32) + bm
    out_ref[...] = jnp.maximum(y, 0.01 * y)
    # TODO(synk): for realistic N/C, tile dst rows and make the stored output lane-dense
    # (pad feature dim to a multiple of 128); at N=C=16 the relayout would cost more than the
    # single masked store it removes.


# ----------------------------------------------------------------------------
# Wrapper (single pallas_call, no grid -> fully resident, single-buffered VMEM)
# ----------------------------------------------------------------------------
def _cost_estimate(N, C, hid, H):
    def layer(din, dout):
        proj = 2 * N * din * (H * dout + H)
        el = 2 * H * N * (H * dout + H)
        scores = 10 * H * N * N
        agg = 2 * H * N * N * dout
        return proj + el + scores + agg

    L = _pack_layout(C, hid, H)
    flops = layer(C, hid) + layer(hid, C) + 2 * N * C * C + 4 * N * C
    transcendentals = 2 * H * N * N + 2 * H * N + N * (hid + C)
    bytes_accessed = (4 * (2 * N * C + N * N)                 # x, out, adj (f32)
                      + 2 * L["w_rows"] * L["w_cols"]          # packed weights (bf16)
                      + 4 * L["p_rows"] * L["p_cols"])         # packed scalars (f32)
    return pl.CostEstimate(flops=int(flops), transcendentals=int(transcendentals),
                           bytes_accessed=int(bytes_accessed))


def spatio_model_forward(packed, adj, features):
    """features: (batch, instance, channel) f32; adj: (N, N) dense adjacency, N = batch*instance."""
    B, I, C = features.shape
    N = B * I
    H, hid = packed["H"], packed["hid"]
    assert packed["C"] == C
    x = features.reshape(N, C)

    kernel = functools.partial(_spatio_fused_kernel, H=H, C=C, hid=hid)
    vmem = lambda: pl.BlockSpec(memory_space=pltpu.MemorySpace.VMEM)

    y = pl.pallas_call(
        kernel,
        out_shape=jax.ShapeDtypeStruct((N, C), jnp.float32),
        in_specs=[vmem(), vmem(), vmem(), vmem()],
        out_specs=vmem(),
        cost_estimate=_cost_estimate(N, C, hid, H),
    )(x, adj, packed["w"], packed["p"])
    return y.reshape(B, I, C)


# ----------------------------------------------------------------------------
# Pure-JAX reference (eval-mode DGL GATConv semantics), deterministic init, example run
# ----------------------------------------------------------------------------
def spatio_model_reference(params, adj, features, num_heads=2):
    B, I, C = features.shape
    x = features.reshape(B * I, C)
    mask = adj > 0.0

    def gat(x, w, al, ar, b):
        H, Dout = al.shape
        z = x @ w
        outs = []
        for h in range(H):
            zh = z[:, h * Dout:(h + 1) * Dout]
            el = zh @ al[h]                                  # (N,) per src
            er = zh @ ar[h]                                  # (N,) per dst
            e = er[:, None] + el[None, :]
            e = jnp.where(e > 0, e, 0.2 * e)
            e = jnp.where(mask, e, -jnp.inf)
            a = jax.nn.softmax(e, axis=1)
            outs.append(a @ zh + b[h])
        m = jnp.mean(jnp.stack(outs, 0), 0)
        return jnp.where(m > 0, m, jnp.exp(jnp.minimum(m, 0.0)) - 1.0)

    h1 = gat(x, params["w1"], params["al1"], params["ar1"], params["b1"])
    h2 = gat(h1, params["w2"], params["al2"], params["ar2"], params["b2"])
    y = h2 @ params["wm"] + params["bm"]
    y = jnp.where(y > 0, y, 0.01 * y)
    return y.reshape(B, I, C)


def init_params(key, channel, num_heads=2):
    out_dim = channel                     # SpatioModel: gru_hidden_dim = out_dim = channel
    hid = 3 * out_dim                     # gnn_hidden_dim = 3 * out_dim
    ks = jax.random.split(key, 8)
    s = 0.1
    return {
        # layer 1: GATConv(out_dim -> hid, heads=2)
        "w1":  s * jax.random.normal(ks[0], (out_dim, num_heads * hid), jnp.float32),
        "al1": s * jax.random.normal(ks[1], (num_heads, hid), jnp.float32),
        "ar1": s * jax.random.normal(ks[2], (num_heads, hid), jnp.float32),
        "b1":  jnp.zeros((num_heads, hid), jnp.float32),
        # layer 2: GATConv(hid -> out_dim, heads=2)
        "w2":  s * jax.random.normal(ks[3], (hid, num_heads * out_dim), jnp.float32),
        "al2": s * jax.random.normal(ks[4], (num_heads, out_dim), jnp.float32),
        "ar2": s * jax.random.normal(ks[5], (num_heads, out_dim), jnp.float32),
        "b2":  jnp.zeros((num_heads, out_dim), jnp.float32),
        # mlp: Linear(out_dim, out_dim)
        "wm":  s * jax.random.normal(ks[6], (out_dim, out_dim), jnp.float32),
        "bm":  s * jax.random.normal(ks[7], (1, out_dim), jnp.float32),
    }


def build_adjacency(num_nodes):
    # deterministic synthetic graph: self-loops + directed ring (src = (dst+1) % N)
    # PRECONDITION: self-loops present (in-degree >= 1) for the -1e30 softmax sentinel path.
    eye = jnp.eye(num_nodes, dtype=jnp.float32)
    ring = jnp.roll(eye, shift=1, axis=1)
    return jnp.clip(eye + ring, 0.0, 1.0)


if __name__ == "__main__":
    batch, instance, channel = 2, 8, 16     # small shapes; N = 16 nodes, feature dim = 16
    key = jax.random.PRNGKey(0)
    k_feat, k_param = jax.random.split(key)

    features = jax.random.normal(k_feat, (batch, instance, channel), jnp.float32)
    adj = build_adjacency(batch * instance)
    params = init_params(k_param, channel)
    packed = pack_params(params)            # done once at init (pre-cast bf16 + packed slabs)

    out = spatio_model_forward(packed, adj, features)
    out = jax.block_until_ready(out)

    ref = spatio_model_reference(params, adj, features)
    err = float(jnp.max(jnp.abs(out - ref)))

    assert out.shape == (batch, instance, channel)
    assert bool(jnp.all(jnp.isfinite(out)))
    # bf16 MXU operands + approx reciprocal -> expect ~1e-3 abs error at this scale.
    assert err < 5e-2, f"max |kernel - reference| = {err}"
    print("KERNEL_OK")
</pallas_src>

<mosaic_0001>
module attributes {stable_mosaic.version = 11 : i64} {
  func.func @_spatio_fused_kernel(%arg0: memref<16x16xf32, #tpu.memory_space<vmem>>, %arg1: memref<16x16xf32, #tpu.memory_space<vmem>>, %arg2: memref<80x128xbf16, #tpu.memory_space<vmem>>, %arg3: memref<8x128xf32, #tpu.memory_space<vmem>>, %arg4: memref<16x16xf32, #tpu.memory_space<vmem>>) attributes {dimension_semantics = [], scalar_prefetch = 0 : i64, scratch_operands = 0 : i64, tpu.core_type = #tpu.core_type<tc>} {
    %c0 = arith.constant 0 : index
    %c0_0 = arith.constant 0 : index
    %0 = vector.load %arg1[%c0, %c0_0] : memref<16x16xf32, #tpu.memory_space<vmem>>, vector<16x16xf32>
    %cst = arith.constant 0.000000e+00 : f32
    %1 = vector.broadcast %cst : f32 to vector<16x16xf32>
    %2 = arith.cmpf ogt, %0, %1 : vector<16x16xf32>
    %c0_1 = arith.constant 0 : index
    %c0_2 = arith.constant 0 : index
    %3 = vector.load %arg2[%c0_1, %c0_2] : memref<80x128xbf16, #tpu.memory_space<vmem>>, vector<16x98xbf16>
    %c16 = arith.constant 16 : index
    %c0_3 = arith.constant 0 : index
    %4 = vector.load %arg2[%c16, %c0_3] : memref<80x128xbf16, #tpu.memory_space<vmem>>, vector<48x34xbf16>
    %c64 = arith.constant 64 : index
    %c0_4 = arith.constant 0 : index
    %5 = vector.load %arg2[%c64, %c0_4] : memref<80x128xbf16, #tpu.memory_space<vmem>>, vector<16x16xbf16>
    %c0_5 = arith.constant 0 : index
    %c0_6 = arith.constant 0 : index
    %6 = vector.load %arg3[%c0_5, %c0_6] : memref<8x128xf32, #tpu.memory_space<vmem>>, vector<2x98xf32>
    %c2 = arith.constant 2 : index
    %c0_7 = arith.constant 0 : index
    %7 = vector.load %arg3[%c2, %c0_7] : memref<8x128xf32, #tpu.memory_space<vmem>>, vector<1x48xf32>
    %c3 = arith.constant 3 : index
    %c0_8 = arith.constant 0 : index
    %8 = vector.load %arg3[%c3, %c0_8] : memref<8x128xf32, #tpu.memory_space<vmem>>, vector<2x34xf32>
    %c5 = arith.constant 5 : index
    %c0_9 = arith.constant 0 : index
    %9 = vector.load %arg3[%c5, %c0_9] : memref<8x128xf32, #tpu.memory_space<vmem>>, vector<1x16xf32>
    %c6 = arith.constant 6 : index
    %c0_10 = arith.constant 0 : index
    %10 = vector.load %arg3[%c6, %c0_10] : memref<8x128xf32, #tpu.memory_space<vmem>>, vector<1x16xf32>
    %c0_11 = arith.constant 0 : index
    %c0_12 = arith.constant 0 : index
    %11 = vector.load %arg0[%c0_11, %c0_12] : memref<16x16xf32, #tpu.memory_space<vmem>>, vector<16x16xf32>
    %12 = arith.truncf %11 : vector<16x16xf32> to vector<16x16xbf16>
    %cst_13 = arith.constant dense<0.000000e+00> : vector<16x98xf32>
    %13 = tpu.matmul %12, %3, %cst_13 {dimension_numbers = #tpu.dot_dimension_numbers<[1], [0], [0], [1], [0, 0, 1, 1], [], []>} : vector<16x16xbf16>, vector<16x98xbf16>, vector<16x98xf32> -> vector<16x98xf32>
    %cst_14 = arith.constant dense<0.000000e+00> : vector<2x16xf32>
    %14 = tpu.matmul %6, %13, %cst_14 {dimension_numbers = #tpu.dot_dimension_numbers<[1], [1], [0], [0], [0, 0, 1, 0], [], []>} : vector<2x98xf32>, vector<16x98xf32>, vector<2x16xf32> -> vector<2x16xf32>
    %15 = vector.extract_strided_slice %13 {offsets = [0, 0], sizes = [16, 48], strides = [1, 1]} : vector<16x98xf32> to vector<16x48xf32>
    %16 = vector.extract_strided_slice %13 {offsets = [0, 96], sizes = [16, 1], strides = [1, 1]} : vector<16x98xf32> to vector<16x1xf32>
    %17 = vector.extract_strided_slice %14 {offsets = [0, 0], sizes = [1, 16], strides = [1, 1]} : vector<2x16xf32> to vector<1x16xf32>
    %18 = vector.broadcast %16 : vector<16x1xf32> to vector<16x16xf32>
    %19 = vector.broadcast %17 : vector<1x16xf32> to vector<16x16xf32>
    %20 = arith.addf %18, %19 : vector<16x16xf32>
    %cst_15 = arith.constant 2.000000e-01 : f32
    %21 = vector.broadcast %cst_15 : f32 to vector<16x16xf32>
    %22 = arith.mulf %21, %20 : vector<16x16xf32>
    %23 = arith.maximumf %20, %22 : vector<16x16xf32>
    %cst_16 = arith.constant -1.000000e+30 : f32
    %24 = vector.broadcast %cst_16 : f32 to vector<16x16xf32>
    %25 = arith.select %2, %23, %24 : vector<16x16xi1>, vector<16x16xf32>
    %cst_17 = arith.constant dense<0xFF800000> : vector<16xf32>
    %26 = vector.multi_reduction <maximumf>, %25, %cst_17 [1] : vector<16x16xf32> to vector<16xf32>
    %27 = vector.shape_cast %26 : vector<16xf32> to vector<16x1xf32>
    %28 = vector.broadcast %27 : vector<16x1xf32> to vector<16x16xf32>
    %29 = arith.subf %25, %28 : vector<16x16xf32>
    %30 = math.exp %29 : vector<16x16xf32>
    %cst_18 = arith.constant dense<0.000000e+00> : vector<16xf32>
    %31 = vector.multi_reduction <add>, %30, %cst_18 [1] : vector<16x16xf32> to vector<16xf32>
    %32 = vector.shape_cast %31 : vector<16xf32> to vector<16x1xf32>
    %cst_19 = arith.constant 1.000000e-30 : f32
    %33 = vector.broadcast %cst_19 : f32 to vector<16x1xf32>
    %34 = arith.maximumf %32, %33 : vector<16x1xf32>
    %35 = tpu.reciprocal %34 {approx = true} : vector<16x1xf32> -> vector<16x1xf32>
    %36 = vector.broadcast %35 : vector<16x1xf32> to vector<16x16xf32>
    %37 = arith.mulf %30, %36 : vector<16x16xf32>
    %38 = arith.truncf %37 : vector<16x16xf32> to vector<16x16xbf16>
    %39 = arith.truncf %15 : vector<16x48xf32> to vector<16x48xbf16>
    %cst_20 = arith.constant dense<0.000000e+00> : vector<16x48xf32>
    %40 = tpu.matmul %38, %39, %cst_20 {dimension_numbers = #tpu.dot_dimension_numbers<[1], [0], [0], [1], [0, 0, 1, 1], [], []>} : vector<16x16xbf16>, vector<16x48xbf16>, vector<16x48xf32> -> vector<16x48xf32>
    %41 = vector.extract_strided_slice %13 {offsets = [0, 48], sizes = [16, 48], strides = [1, 1]} : vector<16x98xf32> to vector<16x48xf32>
    %42 = vector.extract_strided_slice %13 {offsets = [0, 97], sizes = [16, 1], strides = [1, 1]} : vector<16x98xf32> to vector<16x1xf32>
    %43 = vector.extract_strided_slice %14 {offsets = [1, 0], sizes = [1, 16], strides = [1, 1]} : vector<2x16xf32> to vector<1x16xf32>
    %44 = vector.broadcast %42 : vector<16x1xf32> to vector<16x16xf32>
    %45 = vector.broadcast %43 : vector<1x16xf32> to vector<16x16xf32>
    %46 = arith.addf %44, %45 : vector<16x16xf32>
    %cst_21 = arith.constant 2.000000e-01 : f32
    %47 = vector.broadcast %cst_21 : f32 to vector<16x16xf32>
    %48 = arith.mulf %47, %46 : vector<16x16xf32>
    %49 = arith.maximumf %46, %48 : vector<16x16xf32>
    %cst_22 = arith.constant -1.000000e+30 : f32
    %50 = vector.broadcast %cst_22 : f32 to vector<16x16xf32>
    %51 = arith.select %2, %49, %50 : vector<16x16xi1>, vector<16x16xf32>
    %cst_23 = arith.constant dense<0xFF800000> : vector<16xf32>
    %52 = vector.multi_reduction <maximumf>, %51, %cst_23 [1] : vector<16x16xf32> to vector<16xf32>
    %53 = vector.shape_cast %52 : vector<16xf32> to vector<16x1xf32>
    %54 = vector.broadcast %53 : vector<16x1xf32> to vector<16x16xf32>
    %55 = arith.subf %51, %54 : vector<16x16xf32>
    %56 = math.exp %55 : vector<16x16xf32>
    %cst_24 = arith.constant dense<0.000000e+00> : vector<16xf32>
    %57 = vector.multi_reduction <add>, %56, %cst_24 [1] : vector<16x16xf32> to vector<16xf32>
    %58 = vector.shape_cast %57 : vector<16xf32> to vector<16x1xf32>
    %cst_25 = arith.constant 1.000000e-30 : f32
    %59 = vector.broadcast %cst_25 : f32 to vector<16x1xf32>
    %60 = arith.maximumf %58, %59 : vector<16x1xf32>
    %61 = tpu.reciprocal %60 {approx = true} : vector<16x1xf32> -> vector<16x1xf32>
    %62 = vector.broadcast %61 : vector<16x1xf32> to vector<16x16xf32>
    %63 = arith.mulf %56, %62 : vector<16x16xf32>
    %64 = arith.truncf %63 : vector<16x16xf32> to vector<16x16xbf16>
    %65 = arith.truncf %41 : vector<16x48xf32> to vector<16x48xbf16>
    %cst_26 = arith.constant dense<0.000000e+00> : vector<16x48xf32>
    %66 = tpu.matmul %64, %65, %cst_26 {dimension_numbers = #tpu.dot_dimension_numbers<[1], [0], [0], [1], [0, 0, 1, 1], [], []>} : vector<16x16xbf16>, vector<16x48xbf16>, vector<16x48xf32> -> vector<16x48xf32>
    %67 = arith.addf %40, %66 : vector<16x48xf32>
    %cst_27 = arith.constant 5.000000e-01 : f32
    %68 = vector.broadcast %cst_27 : f32 to vector<16x48xf32>
    %69 = arith.mulf %67, %68 : vector<16x48xf32>
    %70 = vector.broadcast %7 : vector<1x48xf32> to vector<16x48xf32>
    %71 = arith.addf %69, %70 : vector<16x48xf32>
    %cst_28 = arith.constant 0.000000e+00 : f32
    %72 = vector.broadcast %cst_28 : f32 to vector<16x48xf32>
    %73 = arith.cmpf ogt, %71, %72 : vector<16x48xf32>
    %cst_29 = arith.constant 0.000000e+00 : f32
    %74 = vector.broadcast %cst_29 : f32 to vector<16x48xf32>
    %75 = arith.minimumf %71, %74 : vector<16x48xf32>
    %76 = math.exp %75 : vector<16x48xf32>
    %cst_30 = arith.constant 1.000000e+00 : f32
    %77 = vector.broadcast %cst_30 : f32 to vector<16x48xf32>
    %78 = arith.subf %76, %77 : vector<16x48xf32>
    %79 = arith.select %73, %71, %78 : vector<16x48xi1>, vector<16x48xf32>
    %80 = arith.truncf %79 : vector<16x48xf32> to vector<16x48xbf16>
    %cst_31 = arith.constant dense<0.000000e+00> : vector<16x34xf32>
    %81 = tpu.matmul %80, %4, %cst_31 {dimension_numbers = #tpu.dot_dimension_numbers<[1], [0], [0], [1], [0, 0, 1, 1], [], []>} : vector<16x48xbf16>, vector<48x34xbf16>, vector<16x34xf32> -> vector<16x34xf32>
    %cst_32 = arith.constant dense<0.000000e+00> : vector<2x16xf32>
    %82 = tpu.matmul %8, %81, %cst_32 {dimension_numbers = #tpu.dot_dimension_numbers<[1], [1], [0], [0], [0, 0, 1, 0], [], []>} : vector<2x34xf32>, vector<16x34xf32>, vector<2x16xf32> -> vector<2x16xf32>
    %83 = vector.extract_strided_slice %81 {offsets = [0, 0], sizes = [16, 16], strides = [1, 1]} : vector<16x34xf32> to vector<16x16xf32>
    %84 = vector.extract_strided_slice %81 {offsets = [0, 32], sizes = [16, 1], strides = [1, 1]} : vector<16x34xf32> to vector<16x1xf32>
    %85 = vector.extract_strided_slice %82 {offsets = [0, 0], sizes = [1, 16], strides = [1, 1]} : vector<2x16xf32> to vector<1x16xf32>
    %86 = vector.broadcast %84 : vector<16x1xf32> to vector<16x16xf32>
    %87 = vector.broadcast %85 : vector<1x16xf32> to vector<16x16xf32>
    %88 = arith.addf %86, %87 : vector<16x16xf32>
    %cst_33 = arith.constant 2.000000e-01 : f32
    %89 = vector.broadcast %cst_33 : f32 to vector<16x16xf32>
    %90 = arith.mulf %89, %88 : vector<16x16xf32>
    %91 = arith.maximumf %88, %90 : vector<16x16xf32>
    %cst_34 = arith.constant -1.000000e+30 : f32
    %92 = vector.broadcast %cst_34 : f32 to vector<16x16xf32>
    %93 = arith.select %2, %91, %92 : vector<16x16xi1>, vector<16x16xf32>
    %cst_35 = arith.constant dense<0xFF800000> : vector<16xf32>
    %94 = vector.multi_reduction <maximumf>, %93, %cst_35 [1] : vector<16x16xf32> to vector<16xf32>
    %95 = vector.shape_cast %94 : vector<16xf32> to vector<16x1xf32>
    %96 = vector.broadcast %95 : vector<16x1xf32> to vector<16x16xf32>
    %97 = arith.subf %93, %96 : vector<16x16xf32>
    %98 = math.exp %97 : vector<16x16xf32>
    %cst_36 = arith.constant dense<0.000000e+00> : vector<16xf32>
    %99 = vector.multi_reduction <add>, %98, %cst_36 [1] : vector<16x16xf32> to vector<16xf32>
    %100 = vector.shape_cast %99 : vector<16xf32> to vector<16x1xf32>
    %cst_37 = arith.constant 1.000000e-30 : f32
    %101 = vector.broadcast %cst_37 : f32 to vector<16x1xf32>
    %102 = arith.maximumf %100, %101 : vector<16x1xf32>
    %103 = tpu.reciprocal %102 {approx = true} : vector<16x1xf32> -> vector<16x1xf32>
    %104 = vector.broadcast %103 : vector<16x1xf32> to vector<16x16xf32>
    %105 = arith.mulf %98, %104 : vector<16x16xf32>
    %106 = arith.truncf %105 : vector<16x16xf32> to vector<16x16xbf16>
    %107 = arith.truncf %83 : vector<16x16xf32> to vector<16x16xbf16>
    %cst_38 = arith.constant dense<0.000000e+00> : vector<16x16xf32>
    %108 = tpu.matmul %106, %107, %cst_38 {dimension_numbers = #tpu.dot_dimension_numbers<[1], [0], [0], [1], [0, 0, 1, 1], [], []>} : vector<16x16xbf16>, vector<16x16xbf16>, vector<16x16xf32> -> vector<16x16xf32>
    %109 = vector.extract_strided_slice %81 {offsets = [0, 16], sizes = [16, 16], strides = [1, 1]} : vector<16x34xf32> to vector<16x16xf32>
    %110 = vector.extract_strided_slice %81 {offsets = [0, 33], sizes = [16, 1], strides = [1, 1]} : vector<16x34xf32> to vector<16x1xf32>
    %111 = vector.extract_strided_slice %82 {offsets = [1, 0], sizes = [1, 16], strides = [1, 1]} : vector<2x16xf32> to vector<1x16xf32>
    %112 = vector.broadcast %110 : vector<16x1xf32> to vector<16x16xf32>
    %113 = vector.broadcast %111 : vector<1x16xf32> to vector<16x16xf32>
    %114 = arith.addf %112, %113 : vector<16x16xf32>
    %cst_39 = arith.constant 2.000000e-01 : f32
    %115 = vector.broadcast %cst_39 : f32 to vector<16x16xf32>
    %116 = arith.mulf %115, %114 : vector<16x16xf32>
    %117 = arith.maximumf %114, %116 : vector<16x16xf32>
    %cst_40 = arith.constant -1.000000e+30 : f32
    %118 = vector.broadcast %cst_40 : f32 to vector<16x16xf32>
    %119 = arith.select %2, %117, %118 : vector<16x16xi1>, vector<16x16xf32>
    %cst_41 = arith.constant dense<0xFF800000> : vector<16xf32>
    %120 = vector.multi_reduction <maximumf>, %119, %cst_41 [1] : vector<16x16xf32> to vector<16xf32>
    %121 = vector.shape_cast %120 : vector<16xf32> to vector<16x1xf32>
    %122 = vector.broadcast %121 : vector<16x1xf32> to vector<16x16xf32>
    %123 = arith.subf %119, %122 : vector<16x16xf32>
    %124 = math.exp %123 : vector<16x16xf32>
    %cst_42 = arith.constant dense<0.000000e+00> : vector<16xf32>
    %125 = vector.multi_reduction <add>, %124, %cst_42 [1] : vector<16x16xf32> to vector<16xf32>
    %126 = vector.shape_cast %125 : vector<16xf32> to vector<16x1xf32>
    %cst_43 = arith.constant 1.000000e-30 : f32
    %127 = vector.broadcast %cst_43 : f32 to vector<16x1xf32>
    %128 = arith.maximumf %126, %127 : vector<16x1xf32>
    %129 = tpu.reciprocal %128 {approx = true} : vector<16x1xf32> -> vector<16x1xf32>
    %130 = vector.broadcast %129 : vector<16x1xf32> to vector<16x16xf32>
    %131 = arith.mulf %124, %130 : vector<16x16xf32>
    %132 = arith.truncf %131 : vector<16x16xf32> to vector<16x16xbf16>
    %133 = arith.truncf %109 : vector<16x16xf32> to vector<16x16xbf16>
    %cst_44 = arith.constant dense<0.000000e+00> : vector<16x16xf32>
    %134 = tpu.matmul %132, %133, %cst_44 {dimension_numbers = #tpu.dot_dimension_numbers<[1], [0], [0], [1], [0, 0, 1, 1], [], []>} : vector<16x16xbf16>, vector<16x16xbf16>, vector<16x16xf32> -> vector<16x16xf32>
    %135 = arith.addf %108, %134 : vector<16x16xf32>
    %cst_45 = arith.constant 5.000000e-01 : f32
    %136 = vector.broadcast %cst_45 : f32 to vector<16x16xf32>
    %137 = arith.mulf %135, %136 : vector<16x16xf32>
    %138 = vector.broadcast %9 : vector<1x16xf32> to vector<16x16xf32>
    %139 = arith.addf %137, %138 : vector<16x16xf32>
    %cst_46 = arith.constant 0.000000e+00 : f32
    %140 = vector.broadcast %cst_46 : f32 to vector<16x16xf32>
    %141 = arith.cmpf ogt, %139, %140 : vector<16x16xf32>
    %cst_47 = arith.constant 0.000000e+00 : f32
    %142 = vector.broadcast %cst_47 : f32 to vector<16x16xf32>
    %143 = arith.minimumf %139, %142 : vector<16x16xf32>
    %144 = math.exp %143 : vector<16x16xf32>
    %cst_48 = arith.constant 1.000000e+00 : f32
    %145 = vector.broadcast %cst_48 : f32 to vector<16x16xf32>
    %146 = arith.subf %144, %145 : vector<16x16xf32>
    %147 = arith.select %141, %139, %146 : vector<16x16xi1>, vector<16x16xf32>
    %148 = arith.truncf %147 : vector<16x16xf32> to vector<16x16xbf16>
    %cst_49 = arith.constant dense<0.000000e+00> : vector<16x16xf32>
    %149 = tpu.matmul %148, %5, %cst_49 {dimension_numbers = #tpu.dot_dimension_numbers<[1], [0], [0], [1], [0, 0, 1, 1], [], []>} : vector<16x16xbf16>, vector<16x16xbf16>, vector<16x16xf32> -> vector<16x16xf32>
    %150 = vector.broadcast %10 : vector<1x16xf32> to vector<16x16xf32>
    %151 = arith.addf %149, %150 : vector<16x16xf32>
    %cst_50 = arith.constant 0.00999999977 : f32
    %152 = vector.broadcast %cst_50 : f32 to vector<16x16xf32>
    %153 = arith.mulf %152, %151 : vector<16x16xf32>
    %154 = arith.maximumf %151, %153 : vector<16x16xf32>
    %c0_51 = arith.constant 0 : index
    %c0_52 = arith.constant 0 : index
    %155 = vector.load %arg4[%c0_51, %c0_52] : memref<16x16xf32, #tpu.memory_space<vmem>>, vector<16x16xf32>
    tpu.vector_store %arg4[%c0_51, %c0_52], %154 {strides = array<i32>} : memref<16x16xf32, #tpu.memory_space<vmem>>, vector<16x16xf32>,
    return
  }
}

</mosaic_0001>

<bundles_post_ra>
// kernel: tpu_custom_call.1
= control target key start
LH: loop header
LB: loop body
LE: loop exit
PB: predicated region body
PF: predicated region fallthrough
CT: control target
= control target key end

     0   :  { %9 = vsyncpa [#allocation3], 0  ;;  %s907_s0 = inlined_call_operand.hbm [shape: f32[16,16], index: 0, kind: input, shape index: {}]   ;;  %s908_s1 = inlined_call_operand.hbm [shape: f32[16,16], index: 1, kind: input, shape index: {}]   ;;  %s909_s2 = inlined_call_operand.hbm [shape: bf16[80,128], index: 2, kind: input, shape index: {}]   ;;  %s910_s3 = inlined_call_operand.hbm [shape: f32[8,128], index: 3, kind: input, shape index: {}]   ;;  %s911_s4 = inlined_call_operand.hbm [shape: f32[16,16], index: 4, kind: output, shape index: {}]  }
   0x1   :  { %10 = vsyncpa [#allocation6], 0 }
   0x2   :  { %11 = vsyncpa [#allocation9], 0 }
   0x3   :  { %12 = vsyncpa [#allocation4], 0  ;;  %s30_s17 = sshll.u32 %s908_s1, 4  ;;  %s789_s18 = smov [#allocation5]   ;;  %s31_s17 = int_to_ptr.hbm [resolvable:$true] %s30_s17 }
   0x4   :  { %s32_s19 = sshll.u32 %s789_s18, 4  ;;  %s17_s22 = sshll.u32 %s907_s0, 4  ;;  %s33_s19 = int_to_ptr.vmem [resolvable:$true] %s32_s19  ;;  %s18_s22 = int_to_ptr.hbm [resolvable:$true] %s17_s22 }
   0x5   :  { %s790_s23 = smov 128   ;;  %s791_s24 = smov 8  }
   0x6   :  { %38 = dma.hbm_to_vmem [thread:$0]  %s31_s17, 256, %s33_s19, [#allocation6], %s790_s23, %s790_s23, %s791_s24  }
   0x7   :  { %s792_s25 = smov [#allocation2]   ;;  %s43_s1 = sshll.u32 %s909_s2, 4  ;;  %s44_s1 = int_to_ptr.hbm [resolvable:$true] %s43_s1 }
   0x8   :  { %s19_s26 = sshll.u32 %s792_s25, 4  ;;  %s793_s0 = smov [#allocation7]   ;;  %s20_s26 = int_to_ptr.vmem [resolvable:$true] %s19_s26 }
   0x9   :  { %25 = dma.hbm_to_vmem [thread:$0]  %s18_s22, 256, %s20_s26, [#allocation3], %s790_s23, %s790_s23, %s791_s24  }
   0xa   :  { %s45_s29 = sshll.u32 %s793_s0, 4  ;;  %s57_s6 = sshll.u32 %s910_s3, 4  ;;  %s46_s29 = int_to_ptr.vmem [resolvable:$true] %s45_s29  ;;  %s58_s6 = int_to_ptr.hbm [resolvable:$true] %s57_s6 }
   0xb   :  { %s794_s7 = smov 64   ;;  %s795_s8 = smov 4  }
   0xc   :  { %51 = dma.hbm_to_vmem [thread:$0]  %s44_s1, 640, %s46_s29, [#allocation6], %s794_s7, %s794_s7, %s795_s8  }
   0xd   :  { %s796_s9 = smov [#allocation8]  }
   0xe   :  { %s59_s10 = sshll.u32 %s796_s9, 4  ;;  %s60_s10 = int_to_ptr.vmem [resolvable:$true] %s59_s10 }
   0xf   :  { %62 = dma.hbm_to_vmem [thread:$0]  %s58_s6, 128, %s60_s10, [#allocation9]  }
  0x10   :  { %781 = dma.done.wait [#allocation3], 256  }
  0x11   :  { %782 = vsyncadd [#allocation3], 4294967040 }
  0x12   :  { %783 = dma.done.wait [#allocation6], 896  }
  0x13   :  { %784 = vsyncadd [#allocation6], 4294966400 }
  0x14   :  { %785 = dma.done.wait [#allocation9], 128  }
  0x15   :  { %786 = vsyncadd [#allocation9], 4294967168  ;;  %v797_v0 = vmov 97   ;;  %v798_v1 = vmov 96   ;;  %v592_v2 = vld [vmem:[#allocation7] sm:$0xff]  ;;  %v100_v4 = vld [vmem:[#allocation2 + $0x8] sm:$0xff] }
  0x16   :  { %613 = vset.pattern.permute.xlu1 %v797_v0  ;;  %612 = vset.pattern.permute.xlu0 %v798_v1  ;;  %v99_v3 = vld [vmem:[#allocation2] sm:$0xff]  ;;  %vm108_vm0 = vcmask 130048   ;;  %vm126_vm1 = vcmask 801792   ;;  %v94_v9 = vld [vmem:[#allocation8] sm:$0x3]  ;;  %v851_v20 = vld [vmem:[#allocation5 + $0x8] sm:$0xff] }
  0x17   :  { %v101_v5 = vpack.c.bf16 %v100_v4, %v99_v3  ;;  %119 = vmatpush.bf16.msra.mxu0 %v592_v2  ;;  %v853_v21 = vld [vmem:[#allocation5] sm:$0xff]  ;;  %vm83_vm2 = vcmp.gt.f32.partialorder %v851_v20, 0.0  ;;  %s799_s2 = smov 80   ;;  %vm315_vm6 = vcmask 392192   ;;  %vm333_vm7 = vcmask 277504   ;;  %s802_s3 = smov 112  }
  0x18   :  { %vm82_vm3 = vcmp.gt.f32.partialorder %v853_v21, 0.0  ;;  %s803_s11 = smov [#allocation10]   ;;  %s540_s15 = sshll.u32 %s911_s4, 4  ;;  %s541_s15 = int_to_ptr.hbm [resolvable:$true] %s540_s15 }
  0x19   :  { %s538_s12 = sshll.u32 %s803_s11, 4  ;;  %s539_s12 = int_to_ptr.vmem [resolvable:$true] %s538_s12 }
  0x1a   :  { %559 = vmatmul.msk.bf16.vlgmr.msra.gmra.mxu0 %vm108_vm0, %v101_v5 }
  0x97   :  { %v121_v6 = vpop.f32.mrf.mxu0 }
  0x98   :  { %200 = vperm.xlu1 %613, %v121_v6   ;;  %157 = vperm.xlu0 %612, %v121_v6  }
  0x9f   :  { %v123_v7 = vpop.f32.mrf.mxu0 }
  0xa0   :  { %204 = vperm.xlu1 %613, %v123_v7   ;;  %161 = vperm.xlu0 %612, %v123_v7   ;;  %v848_v8 = vpack.c.bf16 %v123_v7, %v121_v6 }
  0xa1   :  { %560 = vmatpush.xpose.msk.msra.mxu1 %vm126_vm1, %v123_v7 }
  0xa2   :  { %272 = vmatpush.bf16.msra.mxu3 %v848_v8 }
  0xa5   :  { %561 = vmatpush.xpose.msk.msra.mxu1 %vm126_vm1, %v121_v6 }
  0xa8   :  { %562 = vmatmul.msk.f32.vlgmr.msra.gmra.mxu1 %vm126_vm1, %v94_v9 }
 0x10a   :  { %v201_v10 = vpop.permute.xlu1 %200  ;;  %v158_v11 = vpop.permute.xlu0 %157 }
 0x112   :  { %v205_v15 = vpop.permute.xlu1 %204  ;;  %v162_v16 = vpop.permute.xlu0 %161 }
 0x125   :  { %v153_v12 = vpop.f32.mrf.mxu1 }
 0x126   :  { %v164_v13 = vperm.slane %v153_v12, 0  ;;  %v207_v14 = vperm.slane %v153_v12, 1 }
 0x128   :  { %v165_v17 = vadd.f32 %v164_v13, %v158_v11  ;;  %v208_v18 = vadd.f32 %v207_v14, %v201_v10  ;;  %v209_v19 = vadd.f32 %v207_v14, %v205_v15  ;;  %v166_v22 = vadd.f32 %v164_v13, %v162_v16  ;;  %v595_v14 = vld [vmem:[#allocation7 + $0x18] sm:$0xff]  ;;  %v594_v15 = vld [vmem:[#allocation7 + $0x10] sm:$0xff]  ;;  %v593_v16 = vld [vmem:[#allocation7 + $0x8] sm:$0xff] }
 0x129   :  { %324 = vmatpush.bf16.msrb.mxu0 %v595_v14 }
 0x12a   :  { %v211_v23 = vmul.f32 0.2, %v209_v19  ;;  %v210_v24 = vmul.f32 0.2, %v208_v18  ;;  %v167_v25 = vmul.f32 0.2, %v165_v17 }
 0x12b   :  { %v168_v29 = vmul.f32 0.2, %v166_v22 }
 0x12c   :  { %v213_v26 = vmax.f32 %v209_v19, %v211_v23  ;;  %v212_v27 = vmax.f32 %v208_v18, %v210_v24  ;;  %v169_v28 = vmax.f32 %v165_v17, %v167_v25  ;;  %v800_v19 = vmov 33   ;;  %v618_v24 = vld [vmem:[#allocation8 + $0x2] ss:$0 sm:$0xff] }
 0x12d   :  { %v170_v36 = vmax.f32 %v166_v22, %v168_v29  ;;  %325 = vmatpush.bf16.msrb.mxu0 %v594_v15  ;;  %616 = vset.pattern.permute.xlu2 %v800_v19  ;;  %v801_v22 = vmov 32  }
 0x12e   :  { %v215_v30 = vsel %vm83_vm2, %v213_v26, -1e+30  ;;  %v214_v31 = vsel %vm82_vm3, %v212_v27, -1e+30  ;;  %v171_v32 = vsel %vm82_vm3, %v169_v28, -1e+30  ;;  %614 = vset.pattern.permute.xlu0 %v801_v22  ;;  %615 = vset.pattern.permute.xlu1 %v801_v22 }
 0x12f   :  { %v219_v33 = vsel %vm108_vm0, %v215_v30, -inf  ;;  %v216_v34 = vsel %vm108_vm0, %v214_v31, -inf  ;;  %v173_v35 = vsel %vm108_vm0, %v171_v32, -inf  ;;  %v172_v37 = vsel %vm83_vm2, %v170_v36, -1e+30 }
 0x130   :  { %220 = vmax.xlane.f32.xlu1 %v219_v33  ;;  %217 = vmax.xlane.f32.xlu0 %v216_v34  ;;  %v176_v38 = vsel %vm108_vm0, %v172_v37, -inf }
 0x131   :  { %174 = vmax.xlane.f32.xlu2 %v173_v35  ;;  %326 = vmatpush.bf16.msrb.mxu0 %v593_v16 }
 0x139   :  { %177 = vmax.xlane.f32.xlu2 %v176_v38 }
 0x1a3   :  { %v218_v43 = vpop.xlane.xlu0 %217  ;;  %v221_v50 = vpop.xlane.xlu1 %220 }
 0x1a4   :  { %v175_v39 = vpop.xlane.xlu2 %174  ;;  %v222_v47 = vsub.f32 %v214_v31, %v218_v43  ;;  %v223_v52 = vsub.f32 %v215_v30, %v221_v50 }
 0x1a5   :  { %v179_v40 = vsub.f32 %v171_v32, %v175_v39 }
 0x1a6   :  { %v224_v49 = vmul.f32 1.442695, %v222_v47  ;;  %v226_v54 = vmul.f32 1.442695, %v223_v52 }
 0x1a7   :  { %v181_v41 = vmul.f32 1.442695, %v179_v40 }
 0x1a9   :  { %621 = vpow2.f32 %v181_v41 }
 0x1ac   :  { %v178_v42 = vpop.xlane.xlu2 %177 }
 0x1ad   :  { %v180_v44 = vsub.f32 %v172_v37, %v178_v42 }
 0x1af   :  { %v183_v45 = vmul.f32 1.442695, %v180_v44  ;;  %v622_v46 = vpop.eup %621 }
 0x1b0   :  { %v185_v48 = vsel %vm108_vm0, %v622_v46, 0.0 }
 0x1b1   :  { %623 = vpow2.f32 %v183_v45  ;;  %186 = vadd.xlane.f32.xlu2 %v185_v48 }
 0x1b2   :  { %625 = vpow2.f32 %v224_v49 }
 0x1b3   :  { %627 = vpow2.f32 %v226_v54 }
 0x1b7   :  { %v624_v51 = vpop.eup %623 }
 0x1b8   :  { %v188_v53 = vsel %vm108_vm0, %v624_v51, 0.0  ;;  %v626_v55 = vpop.eup %625 }
 0x1b9   :  { %189 = vadd.xlane.f32.xlu2 %v188_v53  ;;  %v228_v56 = vsel %vm108_vm0, %v626_v55, 0.0  ;;  %v628_v57 = vpop.eup %627 }
 0x1ba   :  { %v231_v58 = vsel %vm108_vm0, %v628_v57, 0.0 }
 0x1c1   :  { %229 = vadd.xlane.f32.xlu2 %v228_v56 }
 0x1c9   :  { %232 = vadd.xlane.f32.xlu2 %v231_v58 }
 0x1e1   :  { %242 = vrot.lane.b32.xlu2 %v848_v8, %s799_s2 }
 0x224   :  { %v187_v59 = vpop.xlane.xlu2 %186 }
 0x225   :  { %v191_v60 = vmax.f32 %v187_v59, 1e-30 }
 0x227   :  { %629 = vrcp.f32 %v191_v60 }
 0x22c   :  { %v190_v61 = vpop.xlane.xlu2 %189 }
 0x22d   :  { %v192_v62 = vmax.f32 %v190_v61, 1e-30  ;;  %v630_v63 = vpop.eup %629 }
 0x22e   :  { %v195_v2 = vmul.f32 %v630_v63, %v622_v46  ;;  %v96_v46 = vld [vmem:[#allocation8 + $0x3] sm:$0x3] }
 0x22f   :  { %631 = vrcp.f32 %v192_v62 }
 0x234   :  { %v230_v0 = vpop.xlane.xlu2 %229 }
 0x235   :  { %v632_v1 = vpop.eup %631  ;;  %v234_v5 = vmax.f32 %v230_v0, 1e-30 }
 0x236   :  { %v196_v3 = vmul.f32 %v632_v1, %v624_v51 }
 0x237   :  { %633 = vrcp.f32 %v234_v5 }
 0x238   :  { %v197_v4 = vpack.c.bf16 %v196_v3, %v195_v2 }
 0x23a   :  { %564 = vmatmul.msk.bf16.vlgmr.msra.gmra.mxu3 %vm108_vm0, %v197_v4 }
 0x23c   :  { %v233_v6 = vpop.xlane.xlu2 %232 }
 0x23d   :  { %v235_v7 = vmax.f32 %v233_v6, 1e-30  ;;  %v634_v8 = vpop.eup %633 }
 0x23e   :  { %v238_v11 = vmul.f32 %v634_v8, %v626_v55 }
 0x23f   :  { %635 = vrcp.f32 %v235_v7 }
 0x244   :  { %v243_v9 = vpop.permute.xlu2 %242 }
 0x245   :  { %v636_v10 = vpop.eup %635  ;;  %255 = vmatpush.bf16.msra.mxu2 %v243_v9 }
 0x246   :  { %v239_v12 = vmul.f32 %v636_v10, %v628_v57 }
 0x248   :  { %v240_v13 = vpack.c.bf16 %v239_v12, %v238_v11 }
 0x24a   :  { %563 = vmatmul.msk.bf16.vlgmr.msra.gmra.mxu2 %vm108_vm0, %v240_v13 }
 0x2bd   :  { %v274_v17 = vpop.f32.mrf.mxu3 }
 0x2c5   :  { %v276_v28 = vpop.f32.mrf.mxu3 }
 0x2cd   :  { %v257_v18 = vpop.f32.mrf.mxu2 }
 0x2ce   :  { %v275_v23 = vadd.f32 %v274_v17, %v257_v18 }
 0x2d0   :  { %v279_v25 = vmul.f32 0.5, %v275_v23 }
 0x2d2   :  { %v282_v26 = vadd.f32 %v618_v24, %v279_v25 }
 0x2d4   :  { %v286_v27 = vmin.f32 %v282_v26, 0.0  ;;  %vm284_vm4 = vcmp.gt.f32.partialorder %v282_v26, 0.0 }
 0x2d5   :  { %v259_v29 = vpop.f32.mrf.mxu2 }
 0x2d6   :  { %v277_v30 = vadd.f32 %v276_v28, %v259_v29  ;;  %v288_v31 = vmul.f32 1.442695, %v286_v27 }
 0x2d8   :  { %v280_v32 = vmul.f32 0.5, %v277_v30  ;;  %637 = vpow2.f32 %v288_v31 }
 0x2da   :  { %v283_v33 = vadd.f32 %v618_v24, %v280_v32 }
 0x2dc   :  { %v287_v34 = vmin.f32 %v283_v33, 0.0  ;;  %vm285_vm5 = vcmp.gt.f32.partialorder %v283_v33, 0.0 }
 0x2de   :  { %v290_v35 = vmul.f32 1.442695, %v287_v34  ;;  %v638_v36 = vpop.eup %637 }
 0x2df   :  { %v565_v37 = vadd.f32 -1.0, %v638_v36 }
 0x2e0   :  { %639 = vpow2.f32 %v290_v35 }
 0x2e1   :  { %v294_v40 = vsel %vm284_vm4, %v282_v26, %v565_v37 }
 0x2e6   :  { %v640_v38 = vpop.eup %639 }
 0x2e7   :  { %v566_v39 = vadd.f32 -1.0, %v640_v38 }
 0x2e9   :  { %v295_v41 = vsel %vm285_vm5, %v283_v33, %v566_v39 }
 0x2ea   :  { %v296_v42 = vpack.c.bf16 %v295_v41, %v294_v40 }
 0x2ec   :  { %579 = vmatmul.msk.bf16.vlgmr.msrb.gmra.mxu0 %vm315_vm6, %v296_v42 }
 0x369   :  { %v328_v43 = vpop.f32.mrf.mxu0 }
 0x36a   :  { %407 = vperm.xlu2 %616, %v328_v43   ;;  %364 = vperm.xlu0 %614, %v328_v43  }
 0x371   :  { %v330_v44 = vpop.f32.mrf.mxu0 }
 0x372   :  { %411 = vperm.xlu2 %616, %v330_v44   ;;  %368 = vperm.xlu1 %615, %v330_v44   ;;  %v876_v45 = vpack.c.bf16 %v330_v44, %v328_v43 }
 0x373   :  { %580 = vmatpush.xpose.msk.msrb.mxu1 %vm333_vm7, %v330_v44  ;;  %617 = vset.pattern.permute.xlu0 %v800_v19 }
 0x374   :  { %479 = vmatpush.bf16.msrb.mxu3 %v876_v45 }
 0x377   :  { %581 = vmatpush.xpose.msk.msrb.mxu1 %vm333_vm7, %v328_v43 }
 0x37a   :  { %582 = vmatmul.msk.f32.vlgmr.msrb.gmra.mxu1 %vm333_vm7, %v96_v46 }
 0x3c4   :  { %v408_v47 = vpop.permute.xlu2 %407 }
 0x3cc   :  { %v412_v53 = vpop.permute.xlu2 %411 }
 0x3dc   :  { %v365_v51 = vpop.permute.xlu0 %364 }
 0x3e4   :  { %v369_v52 = vpop.permute.xlu1 %368 }
 0x3f7   :  { %v360_v48 = vpop.f32.mrf.mxu1 }
 0x3f8   :  { %v371_v49 = vperm.slane %v360_v48, 0  ;;  %v414_v50 = vperm.slane %v360_v48, 1 }
 0x3fa   :  { %v372_v54 = vadd.f32 %v371_v49, %v365_v51  ;;  %v373_v55 = vadd.f32 %v371_v49, %v369_v52  ;;  %v415_v56 = vadd.f32 %v414_v50, %v408_v47  ;;  %v416_v57 = vadd.f32 %v414_v50, %v412_v53  ;;  %v596_v49 = vld [vmem:[#allocation7 + $0x20] sm:$0xff]  ;;  %v619_v53 = vld [vmem:[#allocation8 + $0x5] ss:$0 sm:$0xff] }
 0x3fb   :  { %521 = vmatpush.bf16.msra.mxu1 %v596_v49 }
 0x3fc   :  { %v417_v58 = vmul.f32 0.2, %v415_v56  ;;  %v375_v59 = vmul.f32 0.2, %v373_v55  ;;  %v374_v60 = vmul.f32 0.2, %v372_v54 }
 0x3fd   :  { %v418_v0 = vmul.f32 0.2, %v416_v57 }
 0x3fe   :  { %v419_v61 = vmax.f32 %v415_v56, %v417_v58  ;;  %v377_v62 = vmax.f32 %v373_v55, %v375_v59  ;;  %v376_v63 = vmax.f32 %v372_v54, %v374_v60 }
 0x3ff   :  { %v420_v7 = vmax.f32 %v416_v57, %v418_v0 }
 0x400   :  { %v421_v1 = vsel %vm82_vm3, %v419_v61, -1e+30  ;;  %v379_v2 = vsel %vm83_vm2, %v377_v62, -1e+30  ;;  %v378_v3 = vsel %vm82_vm3, %v376_v63, -1e+30 }
 0x401   :  { %v423_v4 = vsel %vm108_vm0, %v421_v1, -inf  ;;  %v383_v5 = vsel %vm108_vm0, %v379_v2, -inf  ;;  %v380_v6 = vsel %vm108_vm0, %v378_v3, -inf  ;;  %v422_v8 = vsel %vm83_vm2, %v420_v7, -1e+30 }
 0x402   :  { %424 = vmax.xlane.f32.xlu0 %v423_v4  ;;  %384 = vmax.xlane.f32.xlu2 %v383_v5  ;;  %v426_v9 = vsel %vm108_vm0, %v422_v8, -inf }
 0x403   :  { %381 = vmax.xlane.f32.xlu1 %v380_v6 }
 0x40b   :  { %427 = vmax.xlane.f32.xlu1 %v426_v9 }
 0x475   :  { %v385_v10 = vpop.xlane.xlu2 %384  ;;  %v425_v12 = vpop.xlane.xlu0 %424 }
 0x476   :  { %v387_v11 = vsub.f32 %v379_v2, %v385_v10  ;;  %v382_v21 = vpop.xlane.xlu1 %381  ;;  %v429_v16 = vsub.f32 %v421_v1, %v425_v12 }
 0x477   :  { %v386_v13 = vsub.f32 %v378_v3, %v382_v21 }
 0x478   :  { %v390_v14 = vmul.f32 1.442695, %v387_v11  ;;  %v431_v17 = vmul.f32 1.442695, %v429_v16 }
 0x479   :  { %v388_v15 = vmul.f32 1.442695, %v386_v13 }
 0x47a   :  { %641 = vpow2.f32 %v390_v14 }
 0x47b   :  { %643 = vpow2.f32 %v388_v15 }
 0x47c   :  { %645 = vpow2.f32 %v431_v17 }
 0x47e   :  { %v428_v18 = vpop.xlane.xlu1 %427 }
 0x47f   :  { %v430_v19 = vsub.f32 %v422_v8, %v428_v18  ;;  %v620_v8 = vld [vmem:[#allocation8 + $0x6] ss:$0 sm:$0xff] }
 0x480   :  { %v642_v22 = vpop.eup %641 }
 0x481   :  { %v433_v23 = vmul.f32 1.442695, %v430_v19  ;;  %v644_v20 = vpop.eup %643  ;;  %v395_v24 = vsel %vm108_vm0, %v642_v22, 0.0 }
 0x482   :  { %396 = vadd.xlane.f32.xlu1 %v395_v24  ;;  %v392_v25 = vsel %vm108_vm0, %v644_v20, 0.0  ;;  %v646_v26 = vpop.eup %645 }
 0x483   :  { %647 = vpow2.f32 %v433_v23  ;;  %393 = vadd.xlane.f32.xlu2 %v392_v25  ;;  %v435_v29 = vsel %vm108_vm0, %v646_v26, 0.0 }
 0x489   :  { %v648_v27 = vpop.eup %647 }
 0x48a   :  { %v438_v28 = vsel %vm108_vm0, %v648_v27, 0.0 }
 0x48b   :  { %439 = vadd.xlane.f32.xlu0 %v438_v28  ;;  %436 = vadd.xlane.f32.xlu2 %v435_v29 }
 0x49b   :  { %449 = vrot.lane.b32.xlu1 %v876_v45, %s802_s3 }
 0x4f5   :  { %v397_v30 = vpop.xlane.xlu1 %396 }
 0x4f6   :  { %v394_v31 = vpop.xlane.xlu2 %393  ;;  %v399_v32 = vmax.f32 %v397_v30, 1e-30 }
 0x4f7   :  { %v398_v33 = vmax.f32 %v394_v31, 1e-30 }
 0x4f8   :  { %649 = vrcp.f32 %v399_v32 }
 0x4f9   :  { %651 = vrcp.f32 %v398_v33 }
 0x4fe   :  { %v440_v34 = vpop.xlane.xlu0 %439  ;;  %v650_v35 = vpop.eup %649 }
 0x4ff   :  { %v437_v36 = vpop.xlane.xlu2 %436  ;;  %v442_v37 = vmax.f32 %v440_v34, 1e-30  ;;  %v652_v38 = vpop.eup %651  ;;  %v403_v39 = vmul.f32 %v650_v35, %v642_v22 }
 0x500   :  { %v441_v40 = vmax.f32 %v437_v36, 1e-30  ;;  %v402_v41 = vmul.f32 %v652_v38, %v644_v20 }
 0x501   :  { %653 = vrcp.f32 %v442_v37 }
 0x502   :  { %655 = vrcp.f32 %v441_v40  ;;  %v404_v42 = vpack.c.bf16 %v403_v39, %v402_v41 }
 0x504   :  { %584 = vmatmul.msk.bf16.vlgmr.msrb.gmra.mxu3 %vm108_vm0, %v404_v42 }
 0x507   :  { %v654_v43 = vpop.eup %653 }
 0x508   :  { %v656_v44 = vpop.eup %655  ;;  %v446_v46 = vmul.f32 %v654_v43, %v648_v27 }
 0x509   :  { %v445_v45 = vmul.f32 %v656_v44, %v646_v26 }
 0x50b   :  { %v447_v48 = vpack.c.bf16 %v446_v46, %v445_v45 }
 0x50d   :  { %v450_v47 = vpop.permute.xlu1 %449 }
 0x50e   :  { %462 = vmatpush.bf16.msrb.mxu2 %v450_v47 }
 0x511   :  { %583 = vmatmul.msk.bf16.vlgmr.msrb.gmra.mxu2 %vm108_vm0, %v447_v48 }
 0x587   :  { %v481_v50 = vpop.f32.mrf.mxu3 }
 0x58f   :  { %v483_v57 = vpop.f32.mrf.mxu3 }
 0x594   :  { %v464_v51 = vpop.f32.mrf.mxu2 }
 0x595   :  { %v482_v52 = vadd.f32 %v481_v50, %v464_v51 }
 0x597   :  { %v486_v54 = vmul.f32 0.5, %v482_v52 }
 0x599   :  { %v489_v55 = vadd.f32 %v619_v53, %v486_v54 }
 0x59b   :  { %v493_v56 = vmin.f32 %v489_v55, 0.0  ;;  %vm491_vm8 = vcmp.gt.f32.partialorder %v489_v55, 0.0 }
 0x59c   :  { %v466_v58 = vpop.f32.mrf.mxu2 }
 0x59d   :  { %v484_v59 = vadd.f32 %v483_v57, %v466_v58  ;;  %v495_v60 = vmul.f32 1.442695, %v493_v56 }
 0x59f   :  { %v487_v61 = vmul.f32 0.5, %v484_v59  ;;  %657 = vpow2.f32 %v495_v60 }
 0x5a1   :  { %v490_v62 = vadd.f32 %v619_v53, %v487_v61 }
 0x5a3   :  { %v494_v63 = vmin.f32 %v490_v62, 0.0  ;;  %vm492_vm9 = vcmp.gt.f32.partialorder %v490_v62, 0.0 }
 0x5a5   :  { %v497_v0 = vmul.f32 1.442695, %v494_v63  ;;  %v658_v1 = vpop.eup %657 }
 0x5a6   :  { %v585_v2 = vadd.f32 -1.0, %v658_v1 }
 0x5a7   :  { %659 = vpow2.f32 %v497_v0 }
 0x5a8   :  { %v501_v5 = vsel %vm491_vm8, %v489_v55, %v585_v2 }
 0x5ad   :  { %v660_v3 = vpop.eup %659 }
 0x5ae   :  { %v586_v4 = vadd.f32 -1.0, %v660_v3 }
 0x5b0   :  { %v502_v6 = vsel %vm492_vm9, %v490_v62, %v586_v4 }
 0x5b1   :  { %v503_v7 = vpack.c.bf16 %v502_v6, %v501_v5 }
 0x5b3   :  { %591 = vmatmul.msk.bf16.vlgmr.msra.gmra.mxu1 %vm108_vm0, %v503_v7 }
 0x630   :  { %v523_v9 = vpop.f32.mrf.mxu1 }
 0x631   :  { %v524_v10 = vadd.f32 %v620_v8, %v523_v9 }
 0x633   :  { %v528_v11 = vmul.f32 0.01, %v524_v10 }
 0x635   :  { %v530_v21 = vmax.f32 %v524_v10, %v528_v11 }
 0x637   :  { %532 = vst.msk [vmem:[#allocation10] sm:$0xff] %vm108_vm0, %v530_v21 }
 0x638   :  { %v525_v12 = vpop.f32.mrf.mxu1 }
 0x639   :  { %v526_v13 = vadd.f32 %v620_v8, %v525_v12 }
 0x63b   :  { %v529_v14 = vmul.f32 0.01, %v526_v13 }
 0x63d   :  { %v531_v15 = vmax.f32 %v526_v13, %v529_v14 }
 0x63f   :  { %533 = vst.msk [vmem:[#allocation10 + $0x8] sm:$0xff] %vm108_vm0, %v531_v15 }
 0x640   :  { %546 = dma.vmem_to_hbm [thread:$0]  %s539_s12, 256, %s541_s15, [#allocation4], %s790_s23, %s790_s23, %s791_s24  }
 0x641   :  { %787 = dma.done.wait [#allocation4], 256  }
 0x642   :  { %788 = vsyncadd [#allocation4], 4294967040 }
 0x643   :  { %551 = vsyncpa [#allocation3], 1 }
 0x644   :  { %552 = vsyncpa [#allocation6], 1 }
 0x645   :  { %553 = vsyncpa [#allocation9], 1 }
 0x646   :  { %554 = vsyncpa [#allocation4], 1 }

</bundles_post_ra>
